<compile_context>
chip_gen: v7x
topology: tpu7x:2x2x1
jax: 0.10.0
libtpu: 0.0.40
codegen_flags: <defaults>
</compile_context>

<pallas_src>
import functools

import jax
import jax.numpy as jnp
from jax import lax
from jax.experimental import pallas as pl
from jax.experimental.pallas import tpu as pltpu


def _round_up(n, m):
    return ((n + m - 1) // m) * m


# ----------------------------- Pallas kernels ------------------------------ #

def _dilated_causal_conv(w_flat, win, base, *, K, d, C, width, use_im2col):
    """y[:, p] = sum_j w[:, :, j] @ win[:, base + j*d + p], f32 accumulation.

    w_flat : (Cout, K*C), tap-major / channel-minor (w_flat[:, j*C+c]=w[:,c,j])
    win    : (C, W) window in the activation dtype
    """
    if use_im2col:
        a = jnp.concatenate(
            [win[:, base + j * d: base + j * d + width] for j in range(K)],
            axis=0)                                            # (K*C, width)
        return jnp.dot(w_flat, a, preferred_element_type=jnp.float32)
    # Large-channel regime: K accumulated dots, no wide im2col copies.
    acc = None
    for j in range(K):
        part = jnp.dot(w_flat[:, j * C:(j + 1) * C],
                       win[:, base + j * d: base + j * d + width],
                       preferred_element_type=jnp.float32)
        acc = part if acc is None else acc + part
    return acc


def _block_main_path(xcur, halo, w1, b1, w2, b2, t, *, K, d, TL, H, use_im2col):
    """conv1 + relu1 + conv2 + bias + relu2 for one time tile (f32 result).

    xcur : (Cin, TL)  current tile, activation dtype
    halo : (Cin, H)   last H input columns of the previous tile (zero at t==0)
    """
    pad = (K - 1) * d
    HW = TL + pad                        # conv1 outputs needed by conv2
    Cin = xcur.shape[0]
    Cout = w1.shape[0]

    # Window over global time columns [t*TL - H, t*TL + TL).
    xwin = jnp.concatenate([halo, xcur], axis=-1)              # (Cin, H + TL)

    # conv1: h column p is conv1's causal output at global time t*TL - pad + p.
    h = _dilated_causal_conv(w1, xwin, H - 2 * pad, K=K, d=d, C=Cin,
                             width=HW, use_im2col=use_im2col) + b1
    h = jnp.maximum(h, 0.0)                                    # relu1
    # conv2's causal zero padding of h: columns at global time < 0 must be 0,
    # not relu(b1).  Only the first `pad` columns of tile 0 are affected.
    hg = lax.broadcasted_iota(jnp.int32, (1, HW), 1) + t * TL - pad
    h = jnp.where(hg >= 0, h, 0.0)
    h = h.astype(xcur.dtype)             # conv2's MXU operand stays in act dtype

    out = _dilated_causal_conv(w2, h, 0, K=K, d=d, C=Cout,
                               width=TL, use_im2col=use_im2col) + b2
    return jnp.maximum(out, 0.0)                               # relu2


def _tblock_kernel(xcur_ref, w1_ref, b1_ref, w2_ref, b2_ref,
                   o_ref, halo_ref, *, K, d, TL, H, use_im2col):
    """Fused TemporalBlock with identity residual (Cin == Cout)."""
    t = pl.program_id(1)

    @pl.when(t == 0)
    def _():  # columns before the sequence start are causal zero padding
        halo_ref[...] = jnp.zeros_like(halo_ref)

    xcur = xcur_ref[0]
    out = _block_main_path(xcur, halo_ref[...], w1_ref[...], b1_ref[...],
                           w2_ref[...], b2_ref[...], t,
                           K=K, d=d, TL=TL, H=H, use_im2col=use_im2col)
    o_ref[0] = jnp.maximum(out + xcur.astype(jnp.float32), 0.0).astype(o_ref.dtype)
    halo_ref[...] = xcur[:, TL - H:]     # carry the causal halo to tile t+1


def _tblock_down_kernel(xcur_ref, w1_ref, b1_ref, w2_ref, b2_ref,
                        wd_ref, bd_ref, o_ref, halo_ref,
                        *, K, d, TL, H, use_im2col):
    """Fused TemporalBlock with a fused 1x1-conv downsample residual."""
    t = pl.program_id(1)

    @pl.when(t == 0)
    def _():
        halo_ref[...] = jnp.zeros_like(halo_ref)

    xcur = xcur_ref[0]
    out = _block_main_path(xcur, halo_ref[...], w1_ref[...], b1_ref[...],
                           w2_ref[...], b2_ref[...], t,
                           K=K, d=d, TL=TL, H=H, use_im2col=use_im2col)
    res = jnp.dot(wd_ref[...], xcur, preferred_element_type=jnp.float32) + bd_ref[...]
    o_ref[0] = jnp.maximum(out + res, 0.0).astype(o_ref.dtype)
    halo_ref[...] = xcur[:, TL - H:]


# ------------------------------ host wrappers ------------------------------ #

def temporal_block(x, w1, b1, w2, b2, wd, bd, dilation, *, tl):
    """One fused TemporalBlock.  x: (B, Cin, Lp) with Lp % tl == 0."""
    B, Cin, Lp = x.shape
    Cout, _, K = w1.shape
    pad = (K - 1) * dilation
    H = max(128, _round_up(2 * pad, 128))        # carried-halo width (lanes)
    assert Lp % tl == 0 and tl % 128 == 0 and tl >= H

    act_dt = x.dtype
    asz = jnp.dtype(act_dt).itemsize
    # Flatten taps into the contraction dim (W[:, j*C + c] = w[:, c, j]) and
    # cast weights to the activation dtype so the MXU runs at its native rate.
    w1f = jnp.transpose(w1, (0, 2, 1)).reshape(Cout, K * Cin).astype(act_dt)
    w2f = jnp.transpose(w2, (0, 2, 1)).reshape(Cout, K * Cout).astype(act_dt)
    b1c = b1.reshape(Cout, 1).astype(jnp.float32)
    b2c = b2.reshape(Cout, 1).astype(jnp.float32)

    # im2col while the contraction fits one MXU pass; per-tap dots beyond.
    use_im2col = K * max(Cin, Cout) <= 256

    grid = (B, Lp // tl)
    x_spec = pl.BlockSpec((1, Cin, tl), lambda b, t: (b, 0, t))
    w_specs = [
        pl.BlockSpec((Cout, K * Cin), lambda b, t: (0, 0)),
        pl.BlockSpec((Cout, 1), lambda b, t: (0, 0)),
        pl.BlockSpec((Cout, K * Cout), lambda b, t: (0, 0)),
        pl.BlockSpec((Cout, 1), lambda b, t: (0, 0)),
    ]
    out_spec = pl.BlockSpec((1, Cout, tl), lambda b, t: (b, 0, t))
    scratch = [pltpu.VMEM((Cin, H), act_dt)]     # carried causal halo

    # VMEM budget from actual buffer sizes (double-buffered tiles, weights,
    # in-body temps), clamped to v7x's 64 MiB physical VMEM.
    HW = tl + pad
    vmem_est = (
        2 * Cin * tl * asz + 2 * Cout * tl * asz            # pipelined in/out
        + Cin * H * asz                                     # halo scratch
        + 2 * (K * Cin + K * Cout + Cin + 2) * Cout * asz   # weights + biases
        + Cin * (H + tl) * asz                              # xwin
        + (K * Cin * HW + K * Cout * tl) * asz              # im2col temps
        + 3 * Cout * HW * 4 + 3 * Cout * tl * 4)            # f32 h / out / res
    vmem_limit = int(min(max(2 * vmem_est, 24 << 20), 64 << 20))
    cparams = pltpu.CompilerParams(
        dimension_semantics=("parallel", "arbitrary"),
        vmem_limit_bytes=vmem_limit)

    flops = 2 * B * Lp * Cout * K * (Cin + Cout)
    bytes_accessed = B * Lp * (Cin + Cout) * asz + (w1f.size + w2f.size) * asz

    if wd is None:
        assert Cin == Cout
        cost = pl.CostEstimate(flops=int(flops), transcendentals=0,
                               bytes_accessed=int(bytes_accessed))
        kernel = functools.partial(_tblock_kernel, K=K, d=dilation, TL=tl, H=H,
                                   use_im2col=use_im2col)
        return pl.pallas_call(
            kernel,
            out_shape=jax.ShapeDtypeStruct((B, Cout, Lp), act_dt),
            grid=grid,
            in_specs=[x_spec] + w_specs,
            out_specs=out_spec,
            scratch_shapes=scratch,
            compiler_params=cparams,
            cost_estimate=cost,
        )(x, w1f, b1c, w2f, b2c)

    wdf = wd.reshape(Cout, Cin).astype(act_dt)
    bdc = bd.reshape(Cout, 1).astype(jnp.float32)
    flops += 2 * B * Lp * Cout * Cin
    bytes_accessed += wdf.size * asz
    cost = pl.CostEstimate(flops=int(flops), transcendentals=0,
                           bytes_accessed=int(bytes_accessed))
    kernel = functools.partial(_tblock_down_kernel, K=K, d=dilation, TL=tl, H=H,
                               use_im2col=use_im2col)
    return pl.pallas_call(
        kernel,
        out_shape=jax.ShapeDtypeStruct((B, Cout, Lp), act_dt),
        grid=grid,
        in_specs=[x_spec] + w_specs + [
            pl.BlockSpec((Cout, Cin), lambda b, t: (0, 0)),
            pl.BlockSpec((Cout, 1), lambda b, t: (0, 0)),
        ],
        out_specs=out_spec,
        scratch_shapes=scratch,
        compiler_params=cparams,
        cost_estimate=cost,
    )(x, w1f, b1c, w2f, b2c, wdf, bdc)


# ------------------------- parameters & full network ----------------------- #

def weight_norm_effective(v, g):
    """PyTorch weight_norm (dim=0): w = g * v / ||v||_{(in,k)} per output channel."""
    norm = jnp.sqrt(jnp.sum(v * v, axis=(1, 2), keepdims=True))
    return g.reshape(-1, 1, 1) * v / norm


def _pad_conv_weight(w, out_p, in_p):
    o, i, _ = w.shape
    if o == out_p and i == in_p:
        return w
    return jnp.pad(w, ((0, out_p - o), (0, in_p - i), (0, 0)))


def _pad_bias(b, out_p):
    return b if b.shape[0] == out_p else jnp.pad(b, (0, out_p - b.shape[0]))


def init_tcn_params(key, num_inputs, num_channels, kernel_size):
    params = []
    for i, out_ch in enumerate(num_channels):
        in_ch = num_inputs if i == 0 else num_channels[i - 1]
        dilation = 2 ** i
        key, k1, k2, k3, k4, k5, k6 = jax.random.split(key, 7)
        v1 = 0.01 * jax.random.normal(k1, (out_ch, in_ch, kernel_size), jnp.float32)
        g1 = jnp.sqrt(jnp.sum(v1 * v1, axis=(1, 2)))       # weight_norm g init = ||v||
        b1 = 0.01 * jax.random.normal(k2, (out_ch,), jnp.float32)
        v2 = 0.01 * jax.random.normal(k3, (out_ch, out_ch, kernel_size), jnp.float32)
        g2 = jnp.sqrt(jnp.sum(v2 * v2, axis=(1, 2)))
        b2 = 0.01 * jax.random.normal(k4, (out_ch,), jnp.float32)
        if in_ch != out_ch:
            wd = 0.01 * jax.random.normal(k5, (out_ch, in_ch, 1), jnp.float32)
            bd = 0.01 * jax.random.normal(k6, (out_ch,), jnp.float32)
        else:
            wd, bd = None, None
        params.append(dict(v1=v1, g1=g1, b1=b1, v2=v2, g2=g2, b2=b2,
                           wd=wd, bd=bd, dilation=dilation))
    return params


def temporal_conv_net(x, params, *, tl_target=512, activation_dtype=None):
    """Forward pass of TemporalConvNet (eval mode).  x: (B, C_in, L).

    tl_target: lane tile; 512 is a safe default on all TPU generations, may be
    raised to 1024 on v5e/v6e (128 MiB VMEM); keep <= 1024 on v7x (64 MiB).
    activation_dtype: optional storage/MXU dtype for activations+weights
    (e.g. jnp.bfloat16 halves HBM traffic and runs the MXU at native rate);
    biases and accumulation stay f32.
    """
    B, C, L = x.shape
    act_dt = jnp.dtype(activation_dtype) if activation_dtype is not None else x.dtype
    pack = 8 if jnp.dtype(act_dt).itemsize >= 4 else 16   # sublane pack

    # Lane tile: multiple of 128, large enough to hold the biggest causal halo.
    max_pad = max((p["v1"].shape[-1] - 1) * p["dilation"] for p in params)
    tl = max(128, _round_up(2 * max_pad, 128))
    tl = max(tl, min(tl_target, _round_up(L, 128)))
    Lp = _round_up(L, tl)

    # One right-pad to a lane-dense tile multiple plus a channel pad to the
    # sublane pack; padded channels stay exactly zero through every block and
    # padded time columns never influence columns < L (causal convs).
    Cp = _round_up(C, pack)
    out = x.astype(act_dt)
    if Cp != C or Lp != L:
        out = jnp.pad(out, ((0, 0), (0, Cp - C), (0, Lp - L)))

    in_ch = C
    for p in params:
        out_ch = p["v1"].shape[0]
        in_p, out_p = _round_up(in_ch, pack), _round_up(out_ch, pack)
        w1 = _pad_conv_weight(weight_norm_effective(p["v1"], p["g1"]), out_p, in_p)
        w2 = _pad_conv_weight(weight_norm_effective(p["v2"], p["g2"]), out_p, out_p)
        b1 = _pad_bias(p["b1"], out_p)
        b2 = _pad_bias(p["b2"], out_p)
        if p["wd"] is not None:
            wd = _pad_conv_weight(p["wd"], out_p, in_p)
            bd = _pad_bias(p["bd"], out_p)
        else:
            wd, bd = None, None
        out = temporal_block(out, w1, b1, w2, b2, wd, bd, p["dilation"], tl=tl)
        in_ch = out_ch
    return out[:, :params[-1]["v1"].shape[0], :L].astype(x.dtype)


# ----------------------------- pure-JAX reference --------------------------- #

def _ref_causal_conv(x, w, b, dilation):
    K = w.shape[-1]
    pad = (K - 1) * dilation
    y = lax.conv_general_dilated(
        x, w, window_strides=(1,), padding=[(pad, pad)],
        rhs_dilation=(dilation,), dimension_numbers=("NCH", "OIH", "NCH"))
    y = y + b.reshape(1, -1, 1)
    return y[:, :, : x.shape[-1]] if pad > 0 else y


def reference_tcn(x, params):
    out = x
    for p in params:
        w1 = weight_norm_effective(p["v1"], p["g1"])
        w2 = weight_norm_effective(p["v2"], p["g2"])
        h = jnp.maximum(_ref_causal_conv(out, w1, p["b1"], p["dilation"]), 0.0)
        h2 = jnp.maximum(_ref_causal_conv(h, w2, p["b2"], p["dilation"]), 0.0)
        res = out if p["wd"] is None else _ref_causal_conv(out, p["wd"], p["bd"], 1)
        out = jnp.maximum(h2 + res, 0.0)
    return out


# ----------------------------------- main ----------------------------------- #

if __name__ == "__main__":
    key = jax.random.PRNGKey(0)

    # Test 1: toy shapes implied by the module (single time tile).
    B, C_in, L = 2, 4, 16
    num_channels = [8, 8]          # two TemporalBlocks: dilations 1 and 2
    kernel_size = 2
    kx, kp, key = jax.random.split(key, 3)
    x = jax.random.normal(kx, (B, C_in, L), dtype=jnp.float32)
    params = init_tcn_params(kp, C_in, num_channels, kernel_size)

    out = jax.block_until_ready(temporal_conv_net(x, params))
    ref = reference_tcn(x, params)
    assert out.shape == (B, num_channels[-1], L), out.shape
    assert jnp.allclose(out, ref, atol=1e-4, rtol=1e-4), "mismatch vs reference (test 1)"

    # Test 2: longer sequence, several time tiles (exercises the carried
    # causal-halo VMEM scratch across tile boundaries and both residual paths).
    B2, L2 = 2, 300
    kx2, kp2, key = jax.random.split(key, 3)
    x2 = jax.random.normal(kx2, (B2, C_in, L2), dtype=jnp.float32)
    params2 = init_tcn_params(kp2, C_in, num_channels, kernel_size)

    out2 = jax.block_until_ready(temporal_conv_net(x2, params2, tl_target=128))
    ref2 = reference_tcn(x2, params2)
    assert out2.shape == (B2, num_channels[-1], L2), out2.shape
    assert jnp.allclose(out2, ref2, atol=1e-4, rtol=1e-4), "mismatch vs reference (test 2)"

    # Test 3: bf16 activation/weight path (halved HBM traffic, native-rate MXU)
    # against the f32 reference with a correspondingly loose tolerance.
    out3 = jax.block_until_ready(
        temporal_conv_net(x2, params2, tl_target=128, activation_dtype=jnp.bfloat16))
    assert out3.shape == (B2, num_channels[-1], L2), out3.shape
    assert jnp.allclose(out3.astype(jnp.float32), ref2, atol=5e-3, rtol=1e-1), \
        "mismatch vs reference (test 3, bf16)"

    print("KERNEL_OK")
</pallas_src>

<mosaic_0001>
module attributes {stable_mosaic.version = 11 : i64} {
  func.func @_tblock_down_kernel(%arg0: i32, %arg1: i32, %arg2: memref<1x8x128xf32, #tpu.memory_space<vmem>>, %arg3: memref<8x16xf32, #tpu.memory_space<vmem>>, %arg4: memref<8x1xf32, #tpu.memory_space<vmem>>, %arg5: memref<8x16xf32, #tpu.memory_space<vmem>>, %arg6: memref<8x1xf32, #tpu.memory_space<vmem>>, %arg7: memref<8x8xf32, #tpu.memory_space<vmem>>, %arg8: memref<8x1xf32, #tpu.memory_space<vmem>>, %arg9: memref<1x8x128xf32, #tpu.memory_space<vmem>>, %arg10: memref<8x128xf32, #tpu.memory_space<vmem>>) attributes {dimension_semantics = [#tpu.dimension_semantics<parallel>, #tpu.dimension_semantics<arbitrary>], iteration_bounds = array<i64: 2, 1>, scalar_prefetch = 0 : i64, scratch_operands = 1 : i64, tpu.core_type = #tpu.core_type<tc>, window_params = [{transform_indices = @transform_0, window_bounds = array<i64: 1, 8, 128>}, {pipeline_mode = #tpu.pipeline_mode<synchronous>, transform_indices = @transform_1, window_bounds = array<i64: 8, 16>}, {pipeline_mode = #tpu.pipeline_mode<synchronous>, transform_indices = @transform_2, window_bounds = array<i64: 8, 1>}, {pipeline_mode = #tpu.pipeline_mode<synchronous>, transform_indices = @transform_3, window_bounds = array<i64: 8, 16>}, {pipeline_mode = #tpu.pipeline_mode<synchronous>, transform_indices = @transform_4, window_bounds = array<i64: 8, 1>}, {pipeline_mode = #tpu.pipeline_mode<synchronous>, transform_indices = @transform_5, window_bounds = array<i64: 8, 8>}, {pipeline_mode = #tpu.pipeline_mode<synchronous>, transform_indices = @transform_6, window_bounds = array<i64: 8, 1>}, {transform_indices = @transform_7, window_bounds = array<i64: 1, 8, 128>}]} {
    %c0_i32 = arith.constant 0 : i32
    %0 = arith.cmpi eq, %arg1, %c0_i32 : i32
    %1 = arith.extui %0 : i1 to i32
    %c0_i32_0 = arith.constant 0 : i32
    %2 = arith.cmpi ne, %1, %c0_i32_0 : i32
    scf.if %2 {
      %cst_29 = arith.constant 0.000000e+00 : f32
      %51 = vector.broadcast %cst_29 : f32 to vector<8x128xf32>
      %c0_30 = arith.constant 0 : index
      %c0_31 = arith.constant 0 : index
      %52 = vector.load %arg10[%c0_30, %c0_31] : memref<8x128xf32, #tpu.memory_space<vmem>>, vector<8x128xf32>
      tpu.vector_store %arg10[%c0_30, %c0_31], %51 {strides = array<i32>} : memref<8x128xf32, #tpu.memory_space<vmem>>, vector<8x128xf32>,
    } else {
    }
    %c0 = arith.constant 0 : index
    %c0_1 = arith.constant 0 : index
    %c0_2 = arith.constant 0 : index
    %3 = vector.load %arg2[%c0, %c0_1, %c0_2] : memref<1x8x128xf32, #tpu.memory_space<vmem>>, vector<1x8x128xf32>
    %4 = vector.shape_cast %3 : vector<1x8x128xf32> to vector<8x128xf32>
    %c0_3 = arith.constant 0 : index
    %c0_4 = arith.constant 0 : index
    %5 = vector.load %arg10[%c0_3, %c0_4] : memref<8x128xf32, #tpu.memory_space<vmem>>, vector<8x128xf32>
    %c0_5 = arith.constant 0 : index
    %c0_6 = arith.constant 0 : index
    %6 = vector.load %arg3[%c0_5, %c0_6] : memref<8x16xf32, #tpu.memory_space<vmem>>, vector<8x16xf32>
    %c0_7 = arith.constant 0 : index
    %c0_8 = arith.constant 0 : index
    %7 = vector.load %arg4[%c0_7, %c0_8] : memref<8x1xf32, #tpu.memory_space<vmem>>, vector<8x1xf32>
    %c0_9 = arith.constant 0 : index
    %c0_10 = arith.constant 0 : index
    %8 = vector.load %arg5[%c0_9, %c0_10] : memref<8x16xf32, #tpu.memory_space<vmem>>, vector<8x16xf32>
    %c0_11 = arith.constant 0 : index
    %c0_12 = arith.constant 0 : index
    %9 = vector.load %arg6[%c0_11, %c0_12] : memref<8x1xf32, #tpu.memory_space<vmem>>, vector<8x1xf32>
    %10 = tpu.concatenate %5, %4 in 1 : vector<8x128xf32>, vector<8x128xf32> -> vector<8x256xf32>
    %11 = vector.extract_strided_slice %10 {offsets = [0, 126], sizes = [8, 129], strides = [1, 1]} : vector<8x256xf32> to vector<8x129xf32>
    %12 = vector.extract_strided_slice %10 {offsets = [0, 127], sizes = [8, 129], strides = [1, 1]} : vector<8x256xf32> to vector<8x129xf32>
    %13 = tpu.concatenate %11, %12 in 0 : vector<8x129xf32>, vector<8x129xf32> -> vector<16x129xf32>
    %cst = arith.constant dense<0.000000e+00> : vector<8x129xf32>
    %14 = tpu.matmul %6, %13, %cst {dimension_numbers = #tpu.dot_dimension_numbers<[1], [0], [0], [1], [0, 0, 1, 1], [], []>} : vector<8x16xf32>, vector<16x129xf32>, vector<8x129xf32> -> vector<8x129xf32>
    %15 = vector.broadcast %7 : vector<8x1xf32> to vector<8x129xf32>
    %16 = arith.addf %14, %15 : vector<8x129xf32>
    %cst_13 = arith.constant 0.000000e+00 : f32
    %17 = vector.broadcast %cst_13 : f32 to vector<8x129xf32>
    %18 = arith.maximumf %16, %17 : vector<8x129xf32>
    %19 = tpu.iota {dimensions = array<i32: 1>} : vector<1x129xi32>
    %c128_i32 = arith.constant 128 : i32
    %20 = arith.muli %arg1, %c128_i32 : i32
    %21 = vector.broadcast %20 : i32 to vector<1x129xi32>
    %22 = arith.addi %19, %21 : vector<1x129xi32>
    %c1_i32 = arith.constant 1 : i32
    %23 = vector.broadcast %c1_i32 : i32 to vector<1x129xi32>
    %24 = arith.subi %22, %23 : vector<1x129xi32>
    %c0_i32_14 = arith.constant 0 : i32
    %25 = vector.broadcast %c0_i32_14 : i32 to vector<1x129xi32>
    %26 = arith.cmpi sge, %24, %25 : vector<1x129xi32>
    %cst_15 = arith.constant 0.000000e+00 : f32
    %27 = vector.shape_cast %26 : vector<1x129xi1> to vector<1x129xi1>
    %28 = vector.broadcast %27 : vector<1x129xi1> to vector<8x129xi1>
    %29 = vector.broadcast %cst_15 : f32 to vector<8x129xf32>
    %30 = arith.select %28, %18, %29 : vector<8x129xi1>, vector<8x129xf32>
    %31 = vector.extract_strided_slice %30 {offsets = [0, 0], sizes = [8, 128], strides = [1, 1]} : vector<8x129xf32> to vector<8x128xf32>
    %32 = vector.extract_strided_slice %30 {offsets = [0, 1], sizes = [8, 128], strides = [1, 1]} : vector<8x129xf32> to vector<8x128xf32>
    %33 = tpu.concatenate %31, %32 in 0 : vector<8x128xf32>, vector<8x128xf32> -> vector<16x128xf32>
    %cst_16 = arith.constant dense<0.000000e+00> : vector<8x128xf32>
    %34 = tpu.matmul %8, %33, %cst_16 {dimension_numbers = #tpu.dot_dimension_numbers<[1], [0], [0], [1], [0, 0, 1, 1], [], []>} : vector<8x16xf32>, vector<16x128xf32>, vector<8x128xf32> -> vector<8x128xf32>
    %35 = vector.broadcast %9 : vector<8x1xf32> to vector<8x128xf32>
    %36 = arith.addf %34, %35 : vector<8x128xf32>
    %cst_17 = arith.constant 0.000000e+00 : f32
    %37 = vector.broadcast %cst_17 : f32 to vector<8x128xf32>
    %38 = arith.maximumf %36, %37 : vector<8x128xf32>
    %c0_18 = arith.constant 0 : index
    %c0_19 = arith.constant 0 : index
    %39 = vector.load %arg7[%c0_18, %c0_19] : memref<8x8xf32, #tpu.memory_space<vmem>>, vector<8x8xf32>
    %cst_20 = arith.constant dense<0.000000e+00> : vector<8x128xf32>
    %40 = tpu.matmul %39, %4, %cst_20 {dimension_numbers = #tpu.dot_dimension_numbers<[1], [0], [0], [1], [0, 0, 1, 1], [], []>} : vector<8x8xf32>, vector<8x128xf32>, vector<8x128xf32> -> vector<8x128xf32>
    %c0_21 = arith.constant 0 : index
    %c0_22 = arith.constant 0 : index
    %41 = vector.load %arg8[%c0_21, %c0_22] : memref<8x1xf32, #tpu.memory_space<vmem>>, vector<8x1xf32>
    %42 = vector.broadcast %41 : vector<8x1xf32> to vector<8x128xf32>
    %43 = arith.addf %40, %42 : vector<8x128xf32>
    %44 = arith.addf %38, %43 : vector<8x128xf32>
    %cst_23 = arith.constant 0.000000e+00 : f32
    %45 = vector.broadcast %cst_23 : f32 to vector<8x128xf32>
    %46 = arith.maximumf %44, %45 : vector<8x128xf32>
    %c0_24 = arith.constant 0 : index
    %c0_25 = arith.constant 0 : index
    %c0_26 = arith.constant 0 : index
    %47 = vector.load %arg9[%c0_24, %c0_25, %c0_26] : memref<1x8x128xf32, #tpu.memory_space<vmem>>, vector<1x8x128xf32>
    %48 = vector.shape_cast %47 : vector<1x8x128xf32> to vector<8x128xf32>
    %49 = vector.shape_cast %46 : vector<8x128xf32> to vector<1x8x128xf32>
    tpu.vector_store %arg9[%c0_24, %c0_25, %c0_26], %49 {strides = array<i32>} : memref<1x8x128xf32, #tpu.memory_space<vmem>>, vector<1x8x128xf32>,
    %c0_27 = arith.constant 0 : index
    %c0_28 = arith.constant 0 : index
    %50 = vector.load %arg10[%c0_27, %c0_28] : memref<8x128xf32, #tpu.memory_space<vmem>>, vector<8x128xf32>
    tpu.vector_store %arg10[%c0_27, %c0_28], %4 {strides = array<i32>} : memref<8x128xf32, #tpu.memory_space<vmem>>, vector<8x128xf32>,
    return
  }
  func.func @transform_0(%arg0: i32, %arg1: i32) -> (i32, i32, i32) {
    %c0_i32 = arith.constant 0 : i32
    %c0_i32_0 = arith.constant 0 : i32
    return %arg0, %c0_i32, %arg1 : i32, i32, i32
  }
  func.func @transform_1(%arg0: i32, %arg1: i32) -> (i32, i32) {
    %c0_i32 = arith.constant 0 : i32
    %c0_i32_0 = arith.constant 0 : i32
    %c0_i32_1 = arith.constant 0 : i32
    return %c0_i32, %c0_i32_0 : i32, i32
  }
  func.func @transform_2(%arg0: i32, %arg1: i32) -> (i32, i32) {
    %c0_i32 = arith.constant 0 : i32
    %c0_i32_0 = arith.constant 0 : i32
    %c0_i32_1 = arith.constant 0 : i32
    return %c0_i32, %c0_i32_0 : i32, i32
  }
  func.func @transform_3(%arg0: i32, %arg1: i32) -> (i32, i32) {
    %c0_i32 = arith.constant 0 : i32
    %c0_i32_0 = arith.constant 0 : i32
    %c0_i32_1 = arith.constant 0 : i32
    return %c0_i32, %c0_i32_0 : i32, i32
  }
  func.func @transform_4(%arg0: i32, %arg1: i32) -> (i32, i32) {
    %c0_i32 = arith.constant 0 : i32
    %c0_i32_0 = arith.constant 0 : i32
    %c0_i32_1 = arith.constant 0 : i32
    return %c0_i32, %c0_i32_0 : i32, i32
  }
  func.func @transform_5(%arg0: i32, %arg1: i32) -> (i32, i32) {
    %c0_i32 = arith.constant 0 : i32
    %c0_i32_0 = arith.constant 0 : i32
    %c0_i32_1 = arith.constant 0 : i32
    return %c0_i32, %c0_i32_0 : i32, i32
  }
  func.func @transform_6(%arg0: i32, %arg1: i32) -> (i32, i32) {
    %c0_i32 = arith.constant 0 : i32
    %c0_i32_0 = arith.constant 0 : i32
    %c0_i32_1 = arith.constant 0 : i32
    return %c0_i32, %c0_i32_0 : i32, i32
  }
  func.func @transform_7(%arg0: i32, %arg1: i32) -> (i32, i32, i32) {
    %c0_i32 = arith.constant 0 : i32
    %c0_i32_0 = arith.constant 0 : i32
    return %arg0, %c0_i32, %arg1 : i32, i32, i32
  }
}

</mosaic_0001>

<bundles_post_ra>
// kernel: tpu_custom_call.1
= control target key start
LH: loop header
LB: loop body
LE: loop exit
PB: predicated region body
PF: predicated region fallthrough
CT: control target
= control target key end

     0   :  { %12 = vsyncpa [#allocation4], 0  ;;  %s1082_s0 = inlined_call_operand.vmem [shape: f32[2,8,128], index: 0, kind: input, shape index: {}]   ;;  %s1083_s1 = inlined_call_operand.vmem [shape: f32[8,16], index: 1, kind: input, shape index: {}]   ;;  %s1084_s2 = inlined_call_operand.vmem [shape: f32[8,1], index: 2, kind: input, shape index: {}]   ;;  %s1085_s3 = inlined_call_operand.vmem [shape: f32[8,16], index: 3, kind: input, shape index: {}]   ;;  %s1086_s4 = inlined_call_operand.vmem [shape: f32[8,1], index: 4, kind: input, shape index: {}]   ;;  %s1087_s5 = inlined_call_operand.vmem [shape: f32[8,8], index: 5, kind: input, shape index: {}]   ;;  %s1088_s6 = inlined_call_operand.vmem [shape: f32[8,1], index: 6, kind: input, shape index: {}]   ;;  %s1089_s7 = inlined_call_operand.hbm [shape: f32[2,8,128], index: 7, kind: output, shape index: {}]  }
   0x1   :  { %14 = vsyncpa [#allocation4 + $0x1], 0  ;;  %s944_s24 = smov 0   ;;  %s946_s25 = smov 0  }
   0x2   :  { %s948_s26 = smov 0   ;;  %s950_s27 = smov 0  }
   0x3   :  { %s952_s28 = smov 0   ;;  %s954_s29 = smov 0  }
   0x4 LB: > { %s690_s30 = sadd.s32 4294967295, %s894_s29   ;;  %s691_s8 = sadd.s32 4294967294, %s894_s29   ;;  %s894_s29 = sphi %s954_s29, %s20_s29   ;;  %s890_s28 = sphi %s952_s28, %s1096_s28   ;;  %s886_s27 = sphi %s950_s27, %s1095_s27   ;;  %s882_s26 = sphi %s948_s26, %s1094_s26   ;;  %s878_s25 = sphi %s946_s25, %s1093_s25   ;;  %s874_s24 = sphi %s944_s24, %s1092_s24  }
   0x5   : > { %s32_s9 = sadd.s32 1, %s890_s28  ;;  %s195_s10 = sadd.s32 1, %s882_s26 }
   0x6   : > { %p34_p0 = scmp.ge.s32.totalorder %s32_s9, 2  ;;  %p205_p1 = scmp.ne.s32.totalorder %s882_s26, %s878_s25 }
   0x7   : > { %p206_p2 = scmp.eq.s32.totalorder %s690_s30, 1  ;;  %p211_p3 = scmp.ne.s32.totalorder %s878_s25, %s874_s24 }
   0x8   : > { %s1098_s9 = smov (%p34_p0, %s32_s9), 0  ;;  %p212_p5 = scmp.eq.s32.totalorder %s691_s8, 1 }
   0x9   : > { %p984_p4 = por %p206_p2, %p205_p1  ;;  %s190_s12 = ssub.s32 %s890_s28, %s1098_s9 }
   0xa   : > { %p694_p6 = scmp.ge.s32.totalorder %s894_s29, 1  ;;  %p193_p7 = scmp.eq.s32.totalorder %s190_s12, 0 }
   0xb   : > { %p991_p8 = por %p212_p5, %p211_p3  ;;  %p258_p9 = scmp.lt.s32.totalorder %s894_s29, 3 }
   0xc   : > { %s997_s14 = scalar_select %p193_p7, %s882_s26, %s195_s10  }
   0xd   : > { %p259_p10 = pnand %p694_p6, %p258_p9 }
   0xe   : > { %p292_p11 = scmp.lt.s32.totalorder (!%p259_p10), %s886_s27, 1  ;;  %v896_v0 = vmov (!%p259_p10), 0.0   ;;  %s897_s20 = smov (!%p259_p10), 127   ;;  %vm316_vm0 = vcmask (!%p259_p10), 1039360   ;;  %v899_v6 = vmov (!%p259_p10), 0   ;;  %v307_v9 = vld [vmem:[%s1084_s2] sm:$0xff] (!%p259_p10)  ;;  %v415_v22 = vlaneseq (!%p259_p10) }
   0xf   : > { %262 = sbr.rel (%p259_p10) target bundleno = 848 (0x350), region = 48  ;;  %406 = vmatprep.mubr.f32.mxu0 (!%p259_p10), %v896_v0  ;;  %s898_s21 = smov (!%p259_p10), 2   ;;  %809 = vset.pattern.permute.xlu1 (!%p259_p10), %v899_v6  ;;  %v309_v10 = vld [vmem:[%s1086_s4] sm:$0xff] (!%p259_p10)  ;;  %vm331_vm1 = vcmask (!%p259_p10), 15360   ;;  %vm338_vm2 = vcmask (!%p259_p10), 130048   ;;  %v900_v24 = vmov (!%p259_p10), 0.0|0.0  }
  0x10   : > { %815 = vset.pattern.permute.xlu0 (!%p259_p10), %v899_v6  ;;  %v306_v21 = vld [vmem:[%s1083_s1] sm:$0xff] (!%p259_p10)  ;;  %v416_v23 = vand.u32 (!%p259_p10), 127, %v415_v22  ;;  %728 = vmatprep.subr.bf16.mxu1 (!%p259_p10), %v900_v24  ;;  %vm901_vm3 = vmmov (!%p259_p10), 0   ;;  %vm526_vm5 = vcmask (!%p259_p10), 64512   ;;  %vm902_vm6 = vmmov (!%p259_p10), 1   ;;  %s704_s23 = sshll.u32 (!%p259_p10), %s886_s27, 7 }
  0x11   : > { %716 = vmatprep.mubr.msk.f32.mxu1 (!%p259_p10), %vm901_vm3, %v896_v0  ;;  %v519_v32 = vld [vmem:[%s1087_s5] sm:$0xff] (!%p259_p10) }
  0x12   : > { %v698_v25 = vadd.s32 (!%p259_p10), 4294967295, %v416_v23  ;;  %v520_v36 = vld [vmem:[%s1088_s6] sm:$0xff] (!%p259_p10) }
  0x13   : > { %v308_v42 = vld [vmem:[%s1085_s3] sm:$0xff] (!%p259_p10) }
  0x14   : > { %vm424_vm4 = vcmp.ge.s32.totalorder (!%p259_p10), %v698_v25, 0 }
  0x15   : > { %vm730_vm7 = vmpackc.low (!%p259_p10), %vm902_vm6, %vm424_vm4 }
  0x16   : > { %s293_s15 = scalar_select %p292_p11, %s886_s27, 1 }
  0x17   : > { %s903_s27 = smov [#allocation3]  }
  0x18   : > { %s696_s16 = sshll.u32 %s293_s15, 3  ;;  %s1035_s15 = scalar_lea.hbm %s1089_s7, %s704_s23 }
  0x19   : > { %s298_s19 = scalar_lea.vmem %s1082_s0, %s696_s16  ;;  %s820_s18 = sshll.u32 %s903_s27, 4  ;;  %s821_s18 = int_to_ptr.vmem [resolvable:$false] %s820_s18 }
  0x1a   : > { %v304_v1 = vld [vmem:[%s298_s19] sm:$0xff]  ;;  %s822_s19 = scalar_lea.vmem %s821_s18, 256 }
  0x1b   : > { %v794_v2 = vpack.i.bf16 %v304_v1, %v896_v0 }
  0x1d   : > { %795 = vrot.lane.b32.xlu0 %v794_v2, %s897_s20 }
  0x21   : > { %800 = vrot.lane.b32.xlu0 %v794_v2, %s898_s21 }
  0x8f   : > { %v796_v3 = vpop.permute.xlu0 %795 }
  0x90   : > { %v798_v4 = vunpack.i.h.bf16 %v796_v3  ;;  %v797_v5 = vunpack.i.l.bf16 %v796_v3 }
  0x92   : > { %v317_v7 = vsel %vm316_vm0, %v797_v5, %v798_v4 }
  0x93   : > { %v804_v8 = vpack.i.bf16 %v798_v4, %v317_v7  ;;  %v801_v11 = vpop.permute.xlu0 %800 }
  0x94   : > { %v803_v12 = vunpack.i.h.bf16 %v801_v11  ;;  %v802_v13 = vunpack.i.l.bf16 %v801_v11 }
  0x95   : > { %805 = vrot.lane.b32.xlu1 %v804_v8, %s898_s21 }
  0x96   : > { %v332_v17 = vsel %vm331_vm1, %v802_v13, %v803_v12 }
  0x99   : > { %320 = vperm.xlu1 %809, %v307_v9  }
  0x9d   : > { %442 = vperm.xlu1 %809, %v309_v10  }
 0x107   : > { %v806_v14 = vpop.permute.xlu1 %805 }
 0x108   : > { %v808_v15 = vunpack.i.h.bf16 %v806_v14  ;;  %v807_v16 = vunpack.i.l.bf16 %v806_v14 }
 0x10a   : > { %v724_v18 = vpack.c.bf16 %v808_v15, %v803_v12  ;;  %v333_v19 = vsel %vm331_vm1, %v807_v16, %v808_v15 }
 0x10b   : > { %v726_v20 = vpack.c.bf16 %v333_v19, %v332_v17 }
 0x10c   : > { %725 = vmatprep.subr.bf16.mxu0 %v724_v18 }
 0x10d   : > { %727 = vmatpush1.bf16.msra.mxu0 %v726_v20 }
 0x10e   : > { %719 = vmatprep.subr.mxu0 %v896_v0 }
 0x110   : > { %697 = vmatmul.mubr.msk.f32.vlgmr.msra.gmra.mrb[0].mxu0 %vm338_vm2, %v306_v21 }
 0x111   : > { %720 = vmatpush3.msra.mxu0 %v304_v1  ;;  %721 = vmatprep.mubr.msk.f32.mxu0 %vm901_vm3, %v896_v0 }
 0x114   : > { %722 = vmatmul.mubr.msk.f32.vlgmr.msra.gmra.mrb[2].mxu0 %vm526_vm5, %v519_v32 }
 0x118   : > { %v321_v26 = vpop.permute.xlu1 %320 }
 0x11c   : > { %v443_v46 = vpop.permute.xlu1 %442 }
 0x1e3   : > { %v408_v27 = vpop.f32.mrb[0].mxu0 }
 0x1e4   : > { %v409_v28 = vadd.f32 %v408_v27, %v321_v26  ;;  %v410_v29 = vpop.f32.mrb[1].mxu0 }
 0x1e5   : > { %v411_v30 = vadd.f32 %v410_v29, %v321_v26 }
 0x1e6   : > { %v413_v31 = vmax.f32 %v409_v28, 0.0 }
 0x1e7   : > { %v414_v33 = vmax.f32 %v411_v30, 0.0  ;;  %v596_v43 = vpop.f32.mrb[2].mxu0 }
 0x1e8   : > { %v430_v34 = vsel %vm424_vm4, %v413_v31, 0.0  ;;  %v723_v44 = vpop.f32.mrb[3].mxu0 }
 0x1e9   : > { %v810_v35 = vpack.i.bf16 %v414_v33, %v430_v34 }
 0x1eb   : > { %811 = vrot.lane.b32.xlu0 %v810_v35, %s897_s20  ;;  %s289_s20 = sand.u32 1, %s878_s25  }
 0x1ec   : > { %s695_s22 = sshll.u32 %s289_s20, 3  ;;  %s605_s16 = scalar_lea.sflag [#allocation4], %s289_s20 }
 0x1ed   : > { %s291_s30 = scalar_lea.vmem [#allocation3], %s695_s22 }
 0x1ee   : > { %s619_s8 = sshll.u32 %s291_s30, 4  ;;  %s1037_s8 = int_to_ptr.vmem [resolvable:$true] %s619_s8 }
 0x1ef   : > { %523 = vperm.xlu0 %815, %v520_v36   ;;  %s816_s17 = scalar_lea.vmem %s1037_s8, 128  ;;  %p823_p1 = scmp.lt.s32.totalorder %s1037_s8, %s821_s18 }
 0x1f0   : > { %p817_p12 = scmp.ne.s32.totalorder %s1037_s8, %s816_s17  ;;  %p824_p2 = scmp.lt.s32.totalorder %s822_s19, %s816_s17 }
 0x1f2   : > { %p818_p13 = pnand %p817_p12, %p984_p4  ;;  %p825_p3 = por %p824_p2, %p823_p1 }
 0x1f4   : > { %p819_p0 = pneg %p818_p13 }
 0x1f6   : > { %p826_p5 = pnand %p825_p3, %p819_p0 }
 0x25d   : > { %v812_v37 = vpop.permute.xlu0 %811 }
 0x25e   : > { %v814_v38 = vunpack.i.h.bf16 %v812_v37  ;;  %v813_v39 = vunpack.i.l.bf16 %v812_v37 }
 0x260   : > { %v438_v40 = vsel %vm316_vm0, %v813_v39, %v814_v38 }
 0x261   : > { %v729_v41 = vpack.c.bf16 %v438_v40, %v413_v31 }
 0x263   : > { %731 = vmatpush3.bf16.msk.msra.mxu1 %vm730_vm7, %v729_v41 }
 0x266   : > { %717 = vmatmul.mubr.msk.f32.vlgmr.msra.gmra.mrb[0].mxu1 %vm338_vm2, %v308_v42 }
 0x26e   : > { %v524_v45 = vpop.permute.xlu0 %523 }
 0x26f   : > { %v597_v50 = vadd.f32 %v596_v43, %v524_v45 }
 0x339   : > { %v514_v47 = vpop.f32.mrb[0].mxu1 }
 0x33a   : > { %v515_v48 = vadd.f32 %v514_v47, %v443_v46  ;;  %v718_v49 = vpop.f32.mrb[1].mxu1 }
 0x33c   : > { %v518_v51 = vmax.f32 %v515_v48, 0.0 }
 0x33e   : > { %v600_v52 = vadd.f32 %v597_v50, %v518_v51 }
 0x340   : > { %v601_v53 = vmax.f32 %v600_v52, 0.0 }
 0x342   : > { %602 = vst [vmem:[%s291_s30] sm:$0xff] %v601_v53 }
 0x343   : > { %829 = shalt.err (!%p826_p5)
}
 0x344   : > { %s830_s21 = scalar_lea.hbm %s1035_s15, 128  ;;  %s834_s23 = scalar_lea.hbm %s1089_s7, 256 }
 0x345   : > { %p831_p6 = scmp.ne.s32.totalorder %s1035_s15, %s830_s21  ;;  %p835_p10 = scmp.lt.u32.totalorder %s1035_s15, %s1089_s7 }
 0x346   : > { %p836_p11 = scmp.lt.u32.totalorder %s834_s23, %s830_s21  ;;  %p838_p13 = scmp.lt.u32.totalorder %s830_s21, %s1035_s15 }
 0x347   : > { %p832_p7 = pnand %p831_p6, %p984_p4 }
 0x348   : > { %p837_p12 = por %p836_p11, %p835_p10 }
 0x349   : > { %p833_p9 = pneg %p832_p7 }
 0x34a   : > { %p839_p0 = por %p838_p13, %p837_p12 }
 0x34c   : > { %p840_p1 = pnand %p839_p0, %p833_p9 }
 0x34e   : > { %843 = shalt.err (!%p840_p1)
}
 0x34f   : > { %732 = dma.vmem_to_hbm [thread:$0]  (%p984_p4), %s1037_s8, 128, %s1035_s15, %s605_s16  }
 0x350 PF: > { %p738_p2 = scmp.ge.s32.totalorder %s894_s29, 2  ;;  %s631_s12 = sand.u32 1, %s874_s24  }
 0x351   : > { %s632_s17 = scalar_lea.sflag [#allocation4], %s631_s12 }
 0x352   : > { %p735_p3 = pnand %p738_p2, %p991_p8 }
 0x354   : > { %869 = dma.done.wait (!%p735_p3), %s632_s17, 128  }
 0x355   : > { %871 = vsyncadd (!%p735_p3), %s632_s17, 4294967168  ;;  %s20_s29 = sadd.s32 1, %s894_s29   ;;  %s1092_s24 = smov %s878_s25 }
 0x356   : > { %p17_p5 = scmp.ge.s32.totalorder %s20_s29, 4   ;;  %s1093_s25 = smov %s882_s26 }
 0x357   : > { %s1094_s26 = smov %s997_s14  ;;  %s1095_s27 = smov %s890_s28 }
 0x358   : > { %s1096_s28 = smov %s1098_s9  ;;  %19 = sbr.rel (!%p17_p5) target bundleno = 4 (0x4), region = 87 }
 0x35f   :  { %637 = vsyncpa [#allocation4], 1 }
 0x360   :  { %639 = vsyncpa [#allocation4 + $0x1], 1 }

</bundles_post_ra>
